<compile_context>
chip_gen: v7x
topology: tpu7x:2x2x1
jax: 0.10.0
libtpu: 0.0.40
codegen_flags: <defaults>
</compile_context>

<pallas_src>
import functools

import jax
import jax.numpy as jnp
from jax.experimental import pallas as pl
from jax.experimental.pallas import tpu as pltpu


def _round_up(x, m):
    return ((x + m - 1) // m) * m


def vae_kernel(
    # tiled inputs
    x_ref, xd_ref, eps_ref,
    # resident parameters
    w1_ref, b1_ref, ln_g_ref, ln_b_ref,
    w_head_ref, b_head_ref,
    wdec_ref, bdec_ref,
    # outputs
    mu_z_ref, loss_ref,
    *, hidden_logical, latent_dim, ln_eps,
):
    x = x_ref[...]        # (TB, D) original ratings (for the loss)
    xd = xd_ref[...]      # (TB, D) dropout-masked ratings (for the encoder)

    # ---- Encoder: fc1 (1/(1-p) already folded into w1) -> LeakyReLU(0.01) ---
    h = jnp.dot(xd, w1_ref[...], preferred_element_type=jnp.float32) + b1_ref[...]
    h = jnp.where(h >= 0.0, h, 0.01 * h)

    # LayerNorm(40, eps) over the *logical* hidden width.  Padded columns of h
    # are exactly zero (padded w1/b1 columns are zero), so E[h] and E[h^2]
    # over the logical width are obtained by summing all lanes and dividing by
    # the logical width.
    inv_h = 1.0 / float(hidden_logical)
    s1 = jnp.sum(h, axis=-1, keepdims=True) * inv_h
    s2 = jnp.sum(h * h, axis=-1, keepdims=True) * inv_h
    var = jnp.maximum(s2 - s1 * s1, 0.0)             # biased variance
    h1 = (h - s1) * jax.lax.rsqrt(var + ln_eps)
    h1 = h1 * ln_g_ref[...] + ln_b_ref[...]          # padded gamma/beta are 0

    # Fused mu|logvar head: one matmul, split on lanes.
    head = jnp.dot(h1, w_head_ref[...], preferred_element_type=jnp.float32) + b_head_ref[...]
    L = latent_dim
    mu = head[:, :L]
    logvar = head[:, L:]

    # ---- Reparameterize -----------------------------------------------------
    eps = eps_ref[...]
    z = eps * jnp.exp(0.5 * logvar) + mu

    # ---- Decoder + loss -----------------------------------------------------
    logits = jnp.dot(z, wdec_ref[...], preferred_element_type=jnp.float32) + bdec_ref[...]
    # -log(sigmoid(logits)) == softplus(-logits)  (numerically stable form)
    neg = -logits
    softplus_neg = jnp.maximum(neg, 0.0) + jnp.log(1.0 + jnp.exp(-jnp.abs(neg)))
    row_mll = jnp.sum(softplus_neg * x, axis=-1, keepdims=True)          # (TB,1)
    # sum(log q(z|x,mu,logvar) - log p(z|0,0)) ; log(2*pi) cancels and
    # (z-mu)^2/exp(logvar) == eps^2, so:
    row_kld = -0.5 * jnp.sum(logvar + eps * eps - z * z, axis=-1, keepdims=True)

    # ---- Outputs (lane-packed mu|z, per-row loss) ---------------------------
    mu_z_ref[...] = jnp.concatenate([mu, z], axis=-1)
    loss_ref[...] = row_mll + row_kld


def init_params(key, input_dim, latent_dim, enc_hidden=40):
    """PyTorch nn.Linear default init: U(-1/sqrt(fan_in), 1/sqrt(fan_in))."""
    import math
    ks = jax.random.split(key, 8)

    def linear(kw, kb, fan_in, fan_out):
        bound = 1.0 / math.sqrt(fan_in)
        w = jax.random.uniform(kw, (fan_in, fan_out), jnp.float32, -bound, bound)
        b = jax.random.uniform(kb, (1, fan_out), jnp.float32, -bound, bound)
        return w, b

    w1, b1 = linear(ks[0], ks[1], input_dim, enc_hidden)
    wmu, bmu = linear(ks[2], ks[3], enc_hidden, latent_dim)
    wlv, blv = linear(ks[4], ks[5], enc_hidden, latent_dim)
    wdec, bdec = linear(ks[6], ks[7], latent_dim, input_dim)
    ln_g = jnp.ones((1, enc_hidden), jnp.float32)
    ln_b = jnp.zeros((1, enc_hidden), jnp.float32)
    return dict(w1=w1, b1=b1, ln_g=ln_g, ln_b=ln_b, wmu=wmu, bmu=bmu,
                wlv=wlv, blv=blv, wdec=wdec, bdec=bdec)


def vae_forward(x, params, rng_key, *, dropout_rate=0.5, gamma=1.0, block_rows=256):
    """Returns (mu, z, negative_elbo) matching VAE.forward(..., calculate_loss=True)."""
    B, D = x.shape
    H = params["w1"].shape[1]            # 40 (logical hidden of the encoder)
    L = params["wmu"].shape[1]           # latent dim
    Hp = _round_up(H, 128)               # lane-aligned hidden
    L2 = 2 * L
    kl_weight = gamma * 10.0

    # ---- choose a batch tile that fits comfortably in VMEM (v7x: 64 MiB/TC) --
    def need_bytes(tb):
        act = 4 * tb * (2 * D + L + L2 + 1)                           # tiled streams
        wts = 4 * (D * Hp + 3 * Hp + Hp * L2 + L2 + L * D + D)        # resident weights
        return 2 * act + 2 * wts + (4 << 20)                          # x2 double-buffer + slack

    tb = _round_up(min(block_rows, _round_up(B, 8)), 8)
    while tb > 8 and need_bytes(tb) > (48 << 20):
        tb = _round_up(max(8, tb // 2), 8)
    B_pad = _round_up(B, tb)
    grid = B_pad // tb
    vmem_limit = int(min(max(need_bytes(tb), 32 << 20), 56 << 20))

    # ---- randomness: dropout mask + eps generated in the wrapper ------------
    k_mask, k_eps = jax.random.split(rng_key)
    eps = jax.random.normal(k_eps, (B, L), jnp.float32)
    x = x.astype(jnp.float32)
    if dropout_rate > 0.0:
        keep = jax.random.bernoulli(k_mask, 1.0 - dropout_rate, (B, D))
        x_drop = jnp.where(keep, x, 0.0)
        w1_scale = 1.0 / (1.0 - dropout_rate)        # fold dropout scale into w1
    else:
        x_drop = x
        w1_scale = 1.0

    # ---- pad the batch (zero rows; they are masked out in the wrapper) -------
    x_p = jnp.pad(x, ((0, B_pad - B), (0, 0)))
    xd_p = jnp.pad(x_drop, ((0, B_pad - B), (0, 0)))
    eps_p = jnp.pad(eps, ((0, B_pad - B), (0, 0)))

    # ---- pack / pad parameters ------------------------------------------------
    w1 = jnp.pad(params["w1"] * w1_scale, ((0, 0), (0, Hp - H)))
    b1 = jnp.pad(params["b1"], ((0, 0), (0, Hp - H)))
    ln_g = jnp.pad(params["ln_g"], ((0, 0), (0, Hp - H)))
    ln_b = jnp.pad(params["ln_b"], ((0, 0), (0, Hp - H)))
    w_head = jnp.pad(jnp.concatenate([params["wmu"], params["wlv"]], axis=1),
                     ((0, Hp - H), (0, 0)))
    b_head = jnp.concatenate([params["bmu"], params["blv"]], axis=1)
    wdec = params["wdec"]
    bdec = params["bdec"]

    kernel = functools.partial(
        vae_kernel, hidden_logical=H, latent_dim=L, ln_eps=0.1)

    mu_z, row_loss = pl.pallas_call(
        kernel,
        grid=(grid,),
        in_specs=[
            pl.BlockSpec((tb, D), lambda i: (i, 0)),     # x tile (for loss)
            pl.BlockSpec((tb, D), lambda i: (i, 0)),     # dropped x tile (encoder)
            pl.BlockSpec((tb, L), lambda i: (i, 0)),     # eps tile
            pl.BlockSpec((D, Hp), lambda i: (0, 0)),     # w1 (resident)
            pl.BlockSpec((1, Hp), lambda i: (0, 0)),     # b1
            pl.BlockSpec((1, Hp), lambda i: (0, 0)),     # ln gamma
            pl.BlockSpec((1, Hp), lambda i: (0, 0)),     # ln beta
            pl.BlockSpec((Hp, L2), lambda i: (0, 0)),    # fused mu|logvar weight
            pl.BlockSpec((1, L2), lambda i: (0, 0)),     # fused mu|logvar bias
            pl.BlockSpec((L, D), lambda i: (0, 0)),      # decoder weight
            pl.BlockSpec((1, D), lambda i: (0, 0)),      # decoder bias
        ],
        out_specs=(
            pl.BlockSpec((tb, L2), lambda i: (i, 0)),    # packed mu|z
            pl.BlockSpec((tb, 1), lambda i: (i, 0)),     # per-row loss
        ),
        out_shape=(
            jax.ShapeDtypeStruct((B_pad, L2), jnp.float32),
            jax.ShapeDtypeStruct((B_pad, 1), jnp.float32),
        ),
        compiler_params=pltpu.CompilerParams(
            dimension_semantics=("parallel",),
            vmem_limit_bytes=vmem_limit),
    )(x_p, xd_p, eps_p, w1, b1, ln_g, ln_b, w_head, b_head, wdec, bdec)

    mu = mu_z[:B, :L]
    z = mu_z[:B, L:]
    # Normalize by the GLOBAL batch size in the wrapper (not the tile size).
    negative_elbo = kl_weight * jnp.sum(row_loss[:B, 0]) / B
    return mu, z, negative_elbo


if __name__ == "__main__":
    # Small shapes consistent with the module's forward:
    # user_ratings is (batch, input_dim); latent_dim is the VAE bottleneck.
    batch, input_dim, latent_dim, hidden_dim = 50, 256, 16, 64  # hidden_dim unused by forward

    root = jax.random.PRNGKey(0)
    k_param, k_data, k_noise = jax.random.split(root, 3)

    params = init_params(k_param, input_dim, latent_dim)
    # Non-negative "ratings"-like input.
    user_ratings = jax.random.bernoulli(k_data, 0.3, (batch, input_dim)).astype(jnp.float32)

    # block_rows=32 exercises a multi-step batch grid (+ padded last tile) even
    # at these small demo shapes.
    mu, z, negative_elbo = vae_forward(user_ratings, params, k_noise,
                                       dropout_rate=0.5, gamma=1.0, block_rows=32)
    jax.block_until_ready((mu, z, negative_elbo))

    assert mu.shape == (batch, latent_dim)
    assert z.shape == (batch, latent_dim)
    assert negative_elbo.shape == ()
    assert bool(jnp.isfinite(negative_elbo))
    print("KERNEL_OK")
</pallas_src>

<mosaic_0001>
module attributes {stable_mosaic.version = 11 : i64} {
  func.func @vae_kernel(%arg0: i32, %arg1: memref<32x256xf32, #tpu.memory_space<vmem>>, %arg2: memref<32x256xf32, #tpu.memory_space<vmem>>, %arg3: memref<32x16xf32, #tpu.memory_space<vmem>>, %arg4: memref<256x128xf32, #tpu.memory_space<vmem>>, %arg5: memref<1x128xf32, #tpu.memory_space<vmem>>, %arg6: memref<1x128xf32, #tpu.memory_space<vmem>>, %arg7: memref<1x128xf32, #tpu.memory_space<vmem>>, %arg8: memref<128x32xf32, #tpu.memory_space<vmem>>, %arg9: memref<1x32xf32, #tpu.memory_space<vmem>>, %arg10: memref<16x256xf32, #tpu.memory_space<vmem>>, %arg11: memref<1x256xf32, #tpu.memory_space<vmem>>, %arg12: memref<32x32xf32, #tpu.memory_space<vmem>>, %arg13: memref<32x1xf32, #tpu.memory_space<vmem>>) attributes {dimension_semantics = [#tpu.dimension_semantics<parallel>], iteration_bounds = array<i64: 2>, scalar_prefetch = 0 : i64, scratch_operands = 0 : i64, tpu.core_type = #tpu.core_type<tc>, window_params = [{transform_indices = @transform_0, window_bounds = array<i64: 32, 256>}, {transform_indices = @transform_1, window_bounds = array<i64: 32, 256>}, {transform_indices = @transform_2, window_bounds = array<i64: 32, 16>}, {pipeline_mode = #tpu.pipeline_mode<synchronous>, transform_indices = @transform_3, window_bounds = array<i64: 256, 128>}, {pipeline_mode = #tpu.pipeline_mode<synchronous>, transform_indices = @transform_4, window_bounds = array<i64: 1, 128>}, {pipeline_mode = #tpu.pipeline_mode<synchronous>, transform_indices = @transform_5, window_bounds = array<i64: 1, 128>}, {pipeline_mode = #tpu.pipeline_mode<synchronous>, transform_indices = @transform_6, window_bounds = array<i64: 1, 128>}, {pipeline_mode = #tpu.pipeline_mode<synchronous>, transform_indices = @transform_7, window_bounds = array<i64: 128, 32>}, {pipeline_mode = #tpu.pipeline_mode<synchronous>, transform_indices = @transform_8, window_bounds = array<i64: 1, 32>}, {pipeline_mode = #tpu.pipeline_mode<synchronous>, transform_indices = @transform_9, window_bounds = array<i64: 16, 256>}, {pipeline_mode = #tpu.pipeline_mode<synchronous>, transform_indices = @transform_10, window_bounds = array<i64: 1, 256>}, {transform_indices = @transform_11, window_bounds = array<i64: 32, 32>}, {transform_indices = @transform_12, window_bounds = array<i64: 32, 1>}]} {
    %c0 = arith.constant 0 : index
    %c0_0 = arith.constant 0 : index
    %0 = vector.load %arg1[%c0, %c0_0] : memref<32x256xf32, #tpu.memory_space<vmem>>, vector<32x256xf32>
    %c0_1 = arith.constant 0 : index
    %c0_2 = arith.constant 0 : index
    %1 = vector.load %arg2[%c0_1, %c0_2] : memref<32x256xf32, #tpu.memory_space<vmem>>, vector<32x256xf32>
    %c0_3 = arith.constant 0 : index
    %c0_4 = arith.constant 0 : index
    %2 = vector.load %arg4[%c0_3, %c0_4] : memref<256x128xf32, #tpu.memory_space<vmem>>, vector<256x128xf32>
    %cst = arith.constant dense<0.000000e+00> : vector<32x128xf32>
    %3 = tpu.matmul %1, %2, %cst {dimension_numbers = #tpu.dot_dimension_numbers<[1], [0], [0], [1], [0, 0, 1, 1], [], []>} : vector<32x256xf32>, vector<256x128xf32>, vector<32x128xf32> -> vector<32x128xf32>
    %c0_5 = arith.constant 0 : index
    %c0_6 = arith.constant 0 : index
    %4 = vector.load %arg5[%c0_5, %c0_6] : memref<1x128xf32, #tpu.memory_space<vmem>>, vector<1x128xf32>
    %5 = vector.broadcast %4 : vector<1x128xf32> to vector<32x128xf32>
    %6 = arith.addf %3, %5 : vector<32x128xf32>
    %cst_7 = arith.constant 0.000000e+00 : f32
    %7 = vector.broadcast %cst_7 : f32 to vector<32x128xf32>
    %8 = arith.cmpf oge, %6, %7 : vector<32x128xf32>
    %cst_8 = arith.constant 0.00999999977 : f32
    %9 = vector.broadcast %cst_8 : f32 to vector<32x128xf32>
    %10 = arith.mulf %9, %6 : vector<32x128xf32>
    %11 = arith.select %8, %6, %10 : vector<32x128xi1>, vector<32x128xf32>
    %cst_9 = arith.constant dense<0.000000e+00> : vector<32xf32>
    %12 = vector.multi_reduction <add>, %11, %cst_9 [1] : vector<32x128xf32> to vector<32xf32>
    %13 = vector.shape_cast %12 : vector<32xf32> to vector<32x1xf32>
    %cst_10 = arith.constant 2.500000e-02 : f32
    %14 = vector.broadcast %cst_10 : f32 to vector<32x1xf32>
    %15 = arith.mulf %13, %14 : vector<32x1xf32>
    %16 = arith.mulf %11, %11 : vector<32x128xf32>
    %cst_11 = arith.constant dense<0.000000e+00> : vector<32xf32>
    %17 = vector.multi_reduction <add>, %16, %cst_11 [1] : vector<32x128xf32> to vector<32xf32>
    %18 = vector.shape_cast %17 : vector<32xf32> to vector<32x1xf32>
    %cst_12 = arith.constant 2.500000e-02 : f32
    %19 = vector.broadcast %cst_12 : f32 to vector<32x1xf32>
    %20 = arith.mulf %18, %19 : vector<32x1xf32>
    %21 = arith.mulf %15, %15 : vector<32x1xf32>
    %22 = arith.subf %20, %21 : vector<32x1xf32>
    %cst_13 = arith.constant 0.000000e+00 : f32
    %23 = vector.broadcast %cst_13 : f32 to vector<32x1xf32>
    %24 = arith.maximumf %22, %23 : vector<32x1xf32>
    %25 = vector.broadcast %15 : vector<32x1xf32> to vector<32x128xf32>
    %26 = arith.subf %11, %25 : vector<32x128xf32>
    %cst_14 = arith.constant 1.000000e-01 : f32
    %27 = vector.broadcast %cst_14 : f32 to vector<32x1xf32>
    %28 = arith.addf %24, %27 : vector<32x1xf32>
    %29 = math.rsqrt %28 : vector<32x1xf32>
    %30 = vector.broadcast %29 : vector<32x1xf32> to vector<32x128xf32>
    %31 = arith.mulf %26, %30 : vector<32x128xf32>
    %c0_15 = arith.constant 0 : index
    %c0_16 = arith.constant 0 : index
    %32 = vector.load %arg6[%c0_15, %c0_16] : memref<1x128xf32, #tpu.memory_space<vmem>>, vector<1x128xf32>
    %33 = vector.broadcast %32 : vector<1x128xf32> to vector<32x128xf32>
    %34 = arith.mulf %31, %33 : vector<32x128xf32>
    %c0_17 = arith.constant 0 : index
    %c0_18 = arith.constant 0 : index
    %35 = vector.load %arg7[%c0_17, %c0_18] : memref<1x128xf32, #tpu.memory_space<vmem>>, vector<1x128xf32>
    %36 = vector.broadcast %35 : vector<1x128xf32> to vector<32x128xf32>
    %37 = arith.addf %34, %36 : vector<32x128xf32>
    %c0_19 = arith.constant 0 : index
    %c0_20 = arith.constant 0 : index
    %38 = vector.load %arg8[%c0_19, %c0_20] : memref<128x32xf32, #tpu.memory_space<vmem>>, vector<128x32xf32>
    %cst_21 = arith.constant dense<0.000000e+00> : vector<32x32xf32>
    %39 = tpu.matmul %37, %38, %cst_21 {dimension_numbers = #tpu.dot_dimension_numbers<[1], [0], [0], [1], [0, 0, 1, 1], [], []>} : vector<32x128xf32>, vector<128x32xf32>, vector<32x32xf32> -> vector<32x32xf32>
    %c0_22 = arith.constant 0 : index
    %c0_23 = arith.constant 0 : index
    %40 = vector.load %arg9[%c0_22, %c0_23] : memref<1x32xf32, #tpu.memory_space<vmem>>, vector<1x32xf32>
    %41 = vector.broadcast %40 : vector<1x32xf32> to vector<32x32xf32>
    %42 = arith.addf %39, %41 : vector<32x32xf32>
    %43 = vector.extract_strided_slice %42 {offsets = [0, 0], sizes = [32, 16], strides = [1, 1]} : vector<32x32xf32> to vector<32x16xf32>
    %44 = vector.extract_strided_slice %42 {offsets = [0, 16], sizes = [32, 16], strides = [1, 1]} : vector<32x32xf32> to vector<32x16xf32>
    %c0_24 = arith.constant 0 : index
    %c0_25 = arith.constant 0 : index
    %45 = vector.load %arg3[%c0_24, %c0_25] : memref<32x16xf32, #tpu.memory_space<vmem>>, vector<32x16xf32>
    %cst_26 = arith.constant 5.000000e-01 : f32
    %46 = vector.broadcast %cst_26 : f32 to vector<32x16xf32>
    %47 = arith.mulf %46, %44 : vector<32x16xf32>
    %48 = math.exp %47 : vector<32x16xf32>
    %49 = arith.mulf %45, %48 : vector<32x16xf32>
    %50 = arith.addf %49, %43 : vector<32x16xf32>
    %c0_27 = arith.constant 0 : index
    %c0_28 = arith.constant 0 : index
    %51 = vector.load %arg10[%c0_27, %c0_28] : memref<16x256xf32, #tpu.memory_space<vmem>>, vector<16x256xf32>
    %cst_29 = arith.constant dense<0.000000e+00> : vector<32x256xf32>
    %52 = tpu.matmul %50, %51, %cst_29 {dimension_numbers = #tpu.dot_dimension_numbers<[1], [0], [0], [1], [0, 0, 1, 1], [], []>} : vector<32x16xf32>, vector<16x256xf32>, vector<32x256xf32> -> vector<32x256xf32>
    %c0_30 = arith.constant 0 : index
    %c0_31 = arith.constant 0 : index
    %53 = vector.load %arg11[%c0_30, %c0_31] : memref<1x256xf32, #tpu.memory_space<vmem>>, vector<1x256xf32>
    %54 = vector.broadcast %53 : vector<1x256xf32> to vector<32x256xf32>
    %55 = arith.addf %52, %54 : vector<32x256xf32>
    %cst_32 = arith.constant 0.000000e+00 : f32
    %56 = vector.broadcast %cst_32 : f32 to vector<32x256xf32>
    %57 = arith.subf %56, %55 : vector<32x256xf32>
    %cst_33 = arith.constant 0.000000e+00 : f32
    %58 = vector.broadcast %cst_33 : f32 to vector<32x256xf32>
    %59 = arith.maximumf %57, %58 : vector<32x256xf32>
    %60 = math.absf %57 : vector<32x256xf32>
    %cst_34 = arith.constant 0.000000e+00 : f32
    %61 = vector.broadcast %cst_34 : f32 to vector<32x256xf32>
    %62 = arith.subf %61, %60 : vector<32x256xf32>
    %63 = math.exp %62 : vector<32x256xf32>
    %cst_35 = arith.constant 1.000000e+00 : f32
    %64 = vector.broadcast %cst_35 : f32 to vector<32x256xf32>
    %65 = arith.addf %64, %63 : vector<32x256xf32>
    %66 = math.log %65 : vector<32x256xf32>
    %67 = arith.addf %59, %66 : vector<32x256xf32>
    %68 = arith.mulf %67, %0 : vector<32x256xf32>
    %cst_36 = arith.constant dense<0.000000e+00> : vector<32xf32>
    %69 = vector.multi_reduction <add>, %68, %cst_36 [1] : vector<32x256xf32> to vector<32xf32>
    %70 = vector.shape_cast %69 : vector<32xf32> to vector<32x1xf32>
    %71 = arith.mulf %45, %45 : vector<32x16xf32>
    %72 = arith.addf %44, %71 : vector<32x16xf32>
    %73 = arith.mulf %50, %50 : vector<32x16xf32>
    %74 = arith.subf %72, %73 : vector<32x16xf32>
    %cst_37 = arith.constant dense<0.000000e+00> : vector<32xf32>
    %75 = vector.multi_reduction <add>, %74, %cst_37 [1] : vector<32x16xf32> to vector<32xf32>
    %76 = vector.shape_cast %75 : vector<32xf32> to vector<32x1xf32>
    %cst_38 = arith.constant -5.000000e-01 : f32
    %77 = vector.broadcast %cst_38 : f32 to vector<32x1xf32>
    %78 = arith.mulf %77, %76 : vector<32x1xf32>
    %79 = tpu.concatenate %43, %50 in 1 : vector<32x16xf32>, vector<32x16xf32> -> vector<32x32xf32>
    %c0_39 = arith.constant 0 : index
    %c0_40 = arith.constant 0 : index
    %80 = vector.load %arg12[%c0_39, %c0_40] : memref<32x32xf32, #tpu.memory_space<vmem>>, vector<32x32xf32>
    tpu.vector_store %arg12[%c0_39, %c0_40], %79 {strides = array<i32>} : memref<32x32xf32, #tpu.memory_space<vmem>>, vector<32x32xf32>,
    %81 = arith.addf %70, %78 : vector<32x1xf32>
    %c0_41 = arith.constant 0 : index
    %c0_42 = arith.constant 0 : index
    %82 = vector.load %arg13[%c0_41, %c0_42] : memref<32x1xf32, #tpu.memory_space<vmem>>, vector<32x1xf32>
    tpu.vector_store %arg13[%c0_41, %c0_42], %81 {strides = array<i32>} : memref<32x1xf32, #tpu.memory_space<vmem>>, vector<32x1xf32>,
    return
  }
  func.func @transform_0(%arg0: i32) -> (i32, i32) {
    %c0_i32 = arith.constant 0 : i32
    %c0_i32_0 = arith.constant 0 : i32
    return %arg0, %c0_i32 : i32, i32
  }
  func.func @transform_1(%arg0: i32) -> (i32, i32) {
    %c0_i32 = arith.constant 0 : i32
    %c0_i32_0 = arith.constant 0 : i32
    return %arg0, %c0_i32 : i32, i32
  }
  func.func @transform_2(%arg0: i32) -> (i32, i32) {
    %c0_i32 = arith.constant 0 : i32
    %c0_i32_0 = arith.constant 0 : i32
    return %arg0, %c0_i32 : i32, i32
  }
  func.func @transform_3(%arg0: i32) -> (i32, i32) {
    %c0_i32 = arith.constant 0 : i32
    %c0_i32_0 = arith.constant 0 : i32
    %c0_i32_1 = arith.constant 0 : i32
    return %c0_i32, %c0_i32_0 : i32, i32
  }
  func.func @transform_4(%arg0: i32) -> (i32, i32) {
    %c0_i32 = arith.constant 0 : i32
    %c0_i32_0 = arith.constant 0 : i32
    %c0_i32_1 = arith.constant 0 : i32
    return %c0_i32, %c0_i32_0 : i32, i32
  }
  func.func @transform_5(%arg0: i32) -> (i32, i32) {
    %c0_i32 = arith.constant 0 : i32
    %c0_i32_0 = arith.constant 0 : i32
    %c0_i32_1 = arith.constant 0 : i32
    return %c0_i32, %c0_i32_0 : i32, i32
  }
  func.func @transform_6(%arg0: i32) -> (i32, i32) {
    %c0_i32 = arith.constant 0 : i32
    %c0_i32_0 = arith.constant 0 : i32
    %c0_i32_1 = arith.constant 0 : i32
    return %c0_i32, %c0_i32_0 : i32, i32
  }
  func.func @transform_7(%arg0: i32) -> (i32, i32) {
    %c0_i32 = arith.constant 0 : i32
    %c0_i32_0 = arith.constant 0 : i32
    %c0_i32_1 = arith.constant 0 : i32
    return %c0_i32, %c0_i32_0 : i32, i32
  }
  func.func @transform_8(%arg0: i32) -> (i32, i32) {
    %c0_i32 = arith.constant 0 : i32
    %c0_i32_0 = arith.constant 0 : i32
    %c0_i32_1 = arith.constant 0 : i32
    return %c0_i32, %c0_i32_0 : i32, i32
  }
  func.func @transform_9(%arg0: i32) -> (i32, i32) {
    %c0_i32 = arith.constant 0 : i32
    %c0_i32_0 = arith.constant 0 : i32
    %c0_i32_1 = arith.constant 0 : i32
    return %c0_i32, %c0_i32_0 : i32, i32
  }
  func.func @transform_10(%arg0: i32) -> (i32, i32) {
    %c0_i32 = arith.constant 0 : i32
    %c0_i32_0 = arith.constant 0 : i32
    %c0_i32_1 = arith.constant 0 : i32
    return %c0_i32, %c0_i32_0 : i32, i32
  }
  func.func @transform_11(%arg0: i32) -> (i32, i32) {
    %c0_i32 = arith.constant 0 : i32
    %c0_i32_0 = arith.constant 0 : i32
    return %arg0, %c0_i32 : i32, i32
  }
  func.func @transform_12(%arg0: i32) -> (i32, i32) {
    %c0_i32 = arith.constant 0 : i32
    %c0_i32_0 = arith.constant 0 : i32
    return %arg0, %c0_i32 : i32, i32
  }
}

</mosaic_0001>

<bundles_post_ra>
// kernel: tpu_custom_call.1
= control target key start
LH: loop header
LB: loop body
LE: loop exit
PB: predicated region body
PF: predicated region fallthrough
CT: control target
= control target key end

     0   :  { %s2259_s0 = inlined_call_operand.vmem [shape: f32[64,256], index: 0, kind: input, shape index: {}]   ;;  %s2260_s1 = inlined_call_operand.hbm [shape: f32[64,256], index: 1, kind: input, shape index: {}]   ;;  %s2261_s2 = inlined_call_operand.vmem [shape: f32[64,16], index: 2, kind: input, shape index: {}]   ;;  %s2262_s3 = inlined_call_operand.hbm [shape: f32[256,128], index: 3, kind: input, shape index: {}]   ;;  %s2263_s4 = inlined_call_operand.vmem [shape: f32[1,128], index: 4, kind: input, shape index: {}]   ;;  %s2264_s5 = inlined_call_operand.vmem [shape: f32[1,128], index: 5, kind: input, shape index: {}]   ;;  %s2265_s6 = inlined_call_operand.vmem [shape: f32[1,128], index: 6, kind: input, shape index: {}]   ;;  %s2266_s7 = inlined_call_operand.vmem [shape: f32[128,32], index: 7, kind: input, shape index: {}]   ;;  %s2267_s8 = inlined_call_operand.vmem [shape: f32[1,32], index: 8, kind: input, shape index: {}]   ;;  %s2268_s9 = inlined_call_operand.vmem [shape: f32[16,256], index: 9, kind: input, shape index: {}]   ;;  %s2269_s10 = inlined_call_operand.vmem [shape: f32[1,256], index: 10, kind: input, shape index: {}]   ;;  %s2270_s11 = inlined_call_operand.vmem [shape: f32[64,32], index: 11, kind: output, shape index: {0}]   ;;  %s2271_s12 = inlined_call_operand.vmem [shape: f32[64,1], index: 12, kind: output, shape index: {1}]  }
   0x1   :  { %2279 = sst [smem:[#allocation9_spill]] %s2259_s0 }
   0x2   :  { %2280 = sst [smem:[#allocation10_spill]] %s2270_s11 }
   0x3   :  { %2281 = sst [smem:[#allocation11_spill]] %s2271_s12 }
   0x4   :  { %18 = vsyncpa [#allocation3], 0 }
   0x5   :  { %20 = vsyncpa [#allocation3 + $0x1], 0 }
   0x6   :  { %21 = vsyncpa [#allocation5], 0  ;;  %s1837_s21 = smov 0   ;;  %s1839_s22 = smov 0  }
   0x7   :  { %s1841_s23 = smov 0   ;;  %s1843_s24 = smov 0  }
   0x8 LB: > { %s2272_s25 = sadd.s32 4294967295, %s1761_s24   ;;  %p73_p0 = scmp.ne.s32.totalorder %s1753_s22, %s1749_s21  ;;  %s1761_s24 = sphi %s1843_s24, %s2295_s24   ;;  %s1757_s23 = sphi %s1841_s23, %s2298_s23   ;;  %s1753_s22 = sphi %s1839_s22, %s2297_s22   ;;  %s1749_s21 = sphi %s1837_s21, %s2296_s21  }
   0x9   : > { %p1859_p1 = scmp.eq.s32.totalorder %s2272_s25, 0  ;;  %p1356_p2 = scmp.ge.s32.totalorder %s1761_s24, 1 }
   0xa   : > { %p330_p3 = scmp.lt.s32.totalorder %s1761_s24, 3  ;;  %s1763_s29 = smov [#allocation4]  }
   0xb   : > { %s2282_s26 = scalar_select %p1859_p1, 1, 0 }
   0xc   : > { %p1867_p4 = por %p1859_p1, %p73_p0  ;;  %p1871_p5 = pnand %p1356_p2, %p330_p3 }
   0xd   : > { %s342_s30 = sshll.u32 %s1763_s29, 4  ;;  %s1884_s14 = sadd.s32 1, %s1761_s24   ;;  %s343_s30 = int_to_ptr.vmem [resolvable:$true] %s342_s30 }
   0xe   : > { %s2283_s27 = scalar_select %p1867_p4, 1, 0 }
   0xf   : > { %s2284_s28 = scalar_select %p1871_p5, 1, 0 }
  0x10   : > { %p1566_p6 = pneg %p1871_p5  ;;  %2286 = sst [smem:[#allocation8_spill]] %s1884_s14 }
  0x11   : > { %s60_s15 = sadd.s32 1, %s1757_s23  ;;  %s57_s16 = ssub.s32 %s1761_s24, %s1884_s14 }
  0x12   : > { %p1879_p7 = pnand %p1566_p6, %p1859_p1  ;;  %s1665_s19 = scalar_lea.hbm %s2262_s3, 4096 }
  0x13   : > { %p1666_p8 = scmp.ne.s32.totalorder %s2262_s3, %s1665_s19  ;;  %p1672_p12 = scmp.lt.u32.totalorder %s1665_s19, %s2262_s3 }
  0x14   : > { %p1667_p9 = pneg %p1879_p7 }
  0x16   : > { %p1668_p10 = pnand %p1667_p9, %p1666_p8 }
  0x18   : > { %p1669_p11 = pneg %p1668_p10 }
  0x1a   : > { %p1674_p13 = pnand %p1672_p12, %p1669_p11 }
  0x1c   : > { %1677 = shalt.err (!%p1674_p13)
}
  0x1d   : > { %s1678_s11 = scalar_lea.vmem %s343_s30, 4096  ;;  %p1686_p6 = scmp.lt.s32.totalorder %s343_s30, %s343_s30 }
  0x1e   : > { %p1679_p0 = scmp.ne.s32.totalorder %s343_s30, %s1678_s11  ;;  %p1687_p1 = scmp.lt.s32.totalorder %s1678_s11, %s1678_s11 }
  0x20   : > { %p1681_p2 = pnand %p1679_p0, %p1667_p9  ;;  %p1688_p4 = por %p1687_p1, %p1686_p6 }
  0x22   : > { %p1682_p3 = pneg %p1681_p2 }
  0x24   : > { %p1689_p5 = pnand %p1688_p4, %p1682_p3 }
  0x26   : > { %1692 = shalt.err (!%p1689_p5)
}
  0x27   : > { %s1764_s17 = smov 128   ;;  %s1765_s25 = smov 8  }
  0x28   : > { %1569 = dma.hbm_to_vmem [thread:$0]  (!%p1879_p7), %s2262_s3, 4096, %s343_s30, [#allocation5], %s1764_s17, %s1764_s17, %s1765_s25  }
  0x29   : > { %p58_p8 = scmp.eq.s32.totalorder %s57_s16, 0  ;;  %p67_p9 = scmp.ne.s32.totalorder %s1757_s23, %s1753_s22 }
  0x2a   : > { %p68_p1 = scmp.eq.s32.totalorder %s1761_s24, 0  ;;  %p1575_p4 = scmp.lt.s32.totalorder %s1761_s24, 2 }
  0x2b   : > { %s1910_s11 = scalar_select %p58_p8, %s1757_s23, %s60_s15  }
  0x2c   : > { %p69_p5 = por %p68_p1, %p67_p9  ;;  %s387_s20 = sand.u32 1, %s1757_s23  }
  0x2d   : > { %s1359_s21 = sshll.u32 %s387_s20, 6  ;;  %s1386_s29 = sshll.u32 %s1761_s24, 10 }
  0x2e   : > { %s1917_s0 = scalar_lea.hbm %s2260_s1, %s1386_s29  ;;  %s391_s30 = scalar_lea.vmem [#allocation2], %s1359_s21 }
  0x2f   : > { %s399_s13 = sshll.u32 %s391_s30, 4  ;;  %p1921_p7 = pnand %p1575_p4, %p69_p5  ;;  %s1919_s13 = int_to_ptr.vmem [resolvable:$true] %s399_s13 }
  0x30   : > { %s1925_s16 = scalar_lea.sflag [#allocation3], %s387_s20  ;;  %s1693_s17 = scalar_lea.hbm %s1917_s0, 1024 }
  0x31   : > { %p1694_p10 = scmp.ne.s32.totalorder %s1917_s0, %s1693_s17  ;;  %p1695_p11 = pneg %p1921_p7 }
  0x32   : > { %s1698_s25 = scalar_lea.hbm %s2260_s1, 2048  ;;  %p1699_p0 = scmp.lt.u32.totalorder %s1917_s0, %s2260_s1 }
  0x33   : > { %p1696_p12 = pnand %p1695_p11, %p1694_p10  ;;  %p1700_p2 = scmp.lt.u32.totalorder %s1698_s25, %s1693_s17 }
  0x34   : > { %p1702_p6 = scmp.lt.u32.totalorder %s1693_s17, %s1917_s0 }
  0x35   : > { %p1697_p13 = pneg %p1696_p12  ;;  %p1701_p3 = por %p1700_p2, %p1699_p0 }
  0x37   : > { %p1703_p8 = por %p1702_p6, %p1701_p3 }
  0x39   : > { %p1704_p9 = pnand %p1703_p8, %p1697_p13 }
  0x3b   : > { %1707 = shalt.err (!%p1704_p9)
}
  0x3c   : > { %s1708_s20 = scalar_lea.vmem %s1919_s13, 1024  ;;  %s1766_s21 = smov [#allocation2]  }
  0x3d   : > { %p1709_p1 = scmp.ne.s32.totalorder %s1919_s13, %s1708_s20  ;;  %s1713_s29 = sshll.u32 %s1766_s21, 4  ;;  %s1714_s29 = int_to_ptr.vmem [resolvable:$false] %s1713_s29 }
  0x3e   : > { %s1715_s30 = scalar_lea.vmem %s1714_s29, 2048  ;;  %p1716_p10 = scmp.lt.s32.totalorder %s1919_s13, %s1714_s29 }
  0x3f   : > { %p1711_p4 = pnand %p1709_p1, %p1695_p11  ;;  %p1717_p12 = scmp.lt.s32.totalorder %s1715_s30, %s1708_s20 }
  0x41   : > { %p1712_p5 = pneg %p1711_p4  ;;  %p1718_p0 = por %p1717_p12, %p1716_p10 }
  0x43   : > { %p1719_p2 = pnand %p1718_p0, %p1712_p5 }
  0x45   : > { %1722 = shalt.err (!%p1719_p2)
}
  0x46   : > { %s1767_s17 = smov 256   ;;  %s1768_s12 = smov 16  }
  0x47   : > { %1573 = dma.hbm_to_vmem [thread:$0]  (!%p1921_p7), %s1917_s0, 1024, %s1919_s13, %s1925_s16, %s1767_s17, %s1767_s17, %s1768_s12  }
  0x48   : > { %p2288_p11 = scmp.ne.s32.totalorder %s2284_s28, 0 }
  0x49   : > { %s422_s14 = sand.u32 (!%p2288_p11), 1, %s1753_s22   ;;  %p2289_p13 = scmp.ne.s32.totalorder (!%p2288_p11), %s2283_s27, 0 }
  0x4a   : > { %420 = sbr.rel (%p2288_p11) target bundleno = 1316 (0x524), region = 64  ;;  %s1364_s25 = sshll.u32 (!%p2288_p11), %s422_s14, 6 }
  0x4b   : > { %s423_s18 = scalar_lea.sflag (!%p2288_p11), [#allocation3], %s422_s14  ;;  %s1956_s19 = scalar_lea.vmem (!%p2288_p11), [#allocation2], %s1364_s25 }
  0x51   : > { %1740 = dma.done.wait (%p2289_p13), %s423_s18, 1024  }
  0x52   : > { %1742 = vsyncadd (%p2289_p13), %s423_s18, 4294966272  ;;  %p2290_p3 = scmp.ne.s32.totalorder %s2282_s26, 0 }
  0x54   : > { %1744 = dma.done.wait (%p2290_p3), [#allocation5], 4096  }
  0x55   : > { %1746 = vsyncadd (%p2290_p3), [#allocation5], 4294963200  ;;  %v545_v0 = vld [vmem:[#allocation4 + $0x80] sm:$0xff]  ;;  %v546_v1 = vld [vmem:[#allocation4 + $0x88] sm:$0xff]  ;;  %s2291_s16 = sadd.s32 4294967295, %s1761_s24   ;;  %s1770_s27 = smov 112  }
  0x56   : > { %v529_v2 = vld [vmem:[#allocation4] sm:$0xff]  ;;  %v1490_v3 = vpack.c.bf16 %v546_v1, %v545_v0  ;;  %v530_v4 = vld [vmem:[#allocation4 + $0x8] sm:$0xff]  ;;  %v547_v5 = vld [vmem:[#allocation4 + $0x90] sm:$0xff]  ;;  %s1366_s20 = sshll.u32 %s2291_s16, 2  ;;  %s1771_s28 = smov 16   ;;  %vm907_vm4 = vcmask 130048  }
  0x57   : > { %v548_v6 = vld [vmem:[#allocation4 + $0x98] sm:$0xff]  ;;  %v1492_v7 = vpack.c.bf16 %v530_v4, %v529_v2  ;;  %v531_v9 = vld [vmem:[#allocation4 + $0x10] sm:$0xff]  ;;  %v549_v11 = vld [vmem:[#allocation4 + $0xa0] sm:$0xff]  ;;  %p488_p7 = scmp.lt.s32.totalorder %s1366_s20, 7  ;;  %s2292_s30 = sld [smem:[#allocation9_spill]]  ;;  %vm1214_vm5 = vcmask 7168  }
  0x58   : > { %v1494_v8 = vpack.c.bf16 %v548_v6, %v547_v5  ;;  %v532_v10 = vld [vmem:[#allocation4 + $0x18] sm:$0xff]  ;;  %1491 = vmatprep.subr.bf16.mxu0 %v1490_v3  ;;  %v550_v12 = vld [vmem:[#allocation4 + $0xa8] sm:$0xff]  ;;  %v533_v15 = vld [vmem:[#allocation4 + $0x20] sm:$0xff]  ;;  %s2293_s12 = sld [smem:[#allocation11_spill]]  ;;  %s2294_s0 = sld [smem:[#allocation10_spill]]  ;;  %vm1205_vm6 = vcmask 261120  }
  0x59   : > { %1493 = vmatpush3.bf16.msra.mxu0 %v1492_v7  ;;  %v1496_v13 = vpack.c.bf16 %v532_v10, %v531_v9  ;;  %v1498_v14 = vpack.c.bf16 %v550_v12, %v549_v11  ;;  %v534_v16 = vld [vmem:[#allocation4 + $0x28] sm:$0xff]  ;;  %v551_v17 = vld [vmem:[#allocation4 + $0xb0] sm:$0xff]  ;;  %v552_v18 = vld [vmem:[#allocation4 + $0xb8] sm:$0xff]  ;;  %s2300_s20 = smov (!%p488_p7, %s1366_s20), 7 }
  0x5a   : > { %1495 = vmatprep.subr.bf16.mxu0 %v1494_v8  ;;  %v1500_v19 = vpack.c.bf16 %v534_v16, %v533_v15  ;;  %v1502_v20 = vpack.c.bf16 %v552_v18, %v551_v17  ;;  %v535_v21 = vld [vmem:[#allocation4 + $0x30] sm:$0xff]  ;;  %v536_v22 = vld [vmem:[#allocation4 + $0x38] sm:$0xff]  ;;  %v553_v23 = vld [vmem:[#allocation4 + $0xc0] sm:$0xff]  ;;  %s2081_s18 = sshll.u32 %s2300_s20, 3  ;;  %s1387_s16 = sshll.u32 %s2300_s20, 4 }
  0x5b   : > { %v554_v24 = vld [vmem:[#allocation4 + $0xc8] sm:$0xff]  ;;  %v1504_v26 = vpack.c.bf16 %v536_v22, %v535_v21  ;;  %v537_v28 = vld [vmem:[#allocation4 + $0x40] sm:$0xff]  ;;  %v555_v30 = vld [vmem:[#allocation4 + $0xd0] sm:$0xff]  ;;  %s499_s26 = scalar_lea.vmem %s2261_s2, %s2081_s18 }
  0x5c   : > { %v522_v25 = vld [vmem:[%s1956_s19 + $0x8] sm:$0xff]  ;;  %v1506_v27 = vpack.c.bf16 %v554_v24, %v553_v23  ;;  %v556_v31 = vld [vmem:[#allocation4 + $0xd8] sm:$0xff]  ;;  %v539_v34 = vld [vmem:[#allocation4 + $0x50] sm:$0xff] }
  0x5d   : > { %1497 = vmatpush3.bf16.msra.mxu0 %v1496_v13  ;;  %632 = vmatprep.mubr.f32.mxu0 %v522_v25  ;;  %v538_v29 = vld [vmem:[#allocation4 + $0x48] sm:$0xff]  ;;  %v1510_v33 = vpack.c.bf16 %v556_v31, %v555_v30  ;;  %v540_v35 = vld [vmem:[#allocation4 + $0x58] sm:$0xff]  ;;  %v557_v36 = vld [vmem:[#allocation4 + $0xe0] sm:$0xff]  ;;  %s2190_s17 = scalar_lea.vmem %s2292_s30, %s1387_s16 }
  0x5e   : > { %1499 = vmatprep.subr.bf16.mxu0 %v1498_v14  ;;  %v1508_v32 = vpack.c.bf16 %v538_v29, %v537_v28  ;;  %v558_v37 = vld [vmem:[#allocation4 + $0xe8] sm:$0xff]  ;;  %v1512_v38 = vpack.c.bf16 %v540_v35, %v539_v34  ;;  %v541_v40 = vld [vmem:[#allocation4 + $0x60] sm:$0xff]  ;;  %v559_v42 = vld [vmem:[#allocation4 + $0xf0] sm:$0xff]  ;;  %s511_s14 = scalar_lea.vmem %s2293_s12, %s2081_s18 }
  0x5f   : > { %v1514_v39 = vpack.c.bf16 %v558_v37, %v557_v36  ;;  %v542_v41 = vld [vmem:[#allocation4 + $0x68] sm:$0xff]  ;;  %v560_v43 = vld [vmem:[#allocation4 + $0xf8] sm:$0xff]  ;;  %v543_v46 = vld [vmem:[#allocation4 + $0x70] sm:$0xff] }
  0x60   : > { %v1516_v44 = vpack.c.bf16 %v542_v41, %v541_v40  ;;  %v1518_v45 = vpack.c.bf16 %v560_v43, %v559_v42  ;;  %v544_v47 = vld [vmem:[#allocation4 + $0x78] sm:$0xff]  ;;  %v521_v49 = vld [vmem:[%s1956_s19] sm:$0xff]  ;;  %v523_v51 = vld [vmem:[%s1956_s19 + $0x10] sm:$0xff] }
  0x61   : > { %1501 = vmatpush3.bf16.msra.mxu0 %v1500_v19  ;;  %v1520_v48 = vpack.c.bf16 %v544_v47, %v543_v46  ;;  %v524_v50 = vld [vmem:[%s1956_s19 + $0x18] sm:$0xff]  ;;  %v526_v52 = vld [vmem:[%s1956_s19 + $0x28] sm:$0xff]  ;;  %v525_v53 = vld [vmem:[%s1956_s19 + $0x20] sm:$0xff] }
  0x62   : > { %1503 = vmatprep.subr.bf16.mxu0 %v1502_v20  ;;  %v528_v54 = vld [vmem:[%s1956_s19 + $0x38] sm:$0xff]  ;;  %v527_v55 = vld [vmem:[%s1956_s19 + $0x30] sm:$0xff]  ;;  %v743_v56 = vld [vmem:[%s2266_s7] sm:$0xff] }
  0x63   : > { %v744_v57 = vld [vmem:[%s2266_s7 + $0x8] sm:$0xff]  ;;  %v1375_v60 = vld [vmem:[%s2263_s4] ss:$0 sm:$0xff]  ;;  %v745_v24 = vld [vmem:[%s2266_s7 + $0x10] sm:$0xff] }
  0x64   : > { %v1522_v58 = vpack.c.bf16 %v744_v57, %v743_v56  ;;  %v746_v25 = vld [vmem:[%s2266_s7 + $0x18] sm:$0xff]  ;;  %v748_v28 = vld [vmem:[%s2266_s7 + $0x28] sm:$0xff]  ;;  %v749_v30 = vld [vmem:[%s2266_s7 + $0x30] sm:$0xff] }
  0x65   : > { %1505 = vmatpush3.bf16.msra.mxu0 %v1504_v26  ;;  %v1526_v26 = vpack.c.bf16 %v746_v25, %v745_v24  ;;  %v750_v31 = vld [vmem:[%s2266_s7 + $0x38] sm:$0xff]  ;;  %v752_v34 = vld [vmem:[%s2266_s7 + $0x48] sm:$0xff]  ;;  %v753_v36 = vld [vmem:[%s2266_s7 + $0x50] sm:$0xff] }
  0x66   : > { %1507 = vmatprep.subr.bf16.mxu0 %v1506_v27  ;;  %1523 = vmatprep.subr.bf16.mxu1 %v1522_v58  ;;  %v747_v27 = vld [vmem:[%s2266_s7 + $0x20] sm:$0xff]  ;;  %v754_v37 = vld [vmem:[%s2266_s7 + $0x58] sm:$0xff]  ;;  %v756_v40 = vld [vmem:[%s2266_s7 + $0x68] sm:$0xff] }
  0x67   : > { %1525 = vmatpush3.bf16.msra.mxu1 %v1522_v58  ;;  %v1530_v29 = vpack.c.bf16 %v748_v28, %v747_v27  ;;  %v757_v42 = vld [vmem:[%s2266_s7 + $0x70] sm:$0xff]  ;;  %v758_v43 = vld [vmem:[%s2266_s7 + $0x78] sm:$0xff] }
  0x68   : > { %1527 = vmatprep.subr.bf16.mxu1 %v1526_v26 }
  0x69   : > { %1509 = vmatpush3.bf16.msra.mxu0 %v1508_v32  ;;  %v1534_v32 = vpack.c.bf16 %v750_v31, %v749_v30 }
  0x6a   : > { %1511 = vmatprep.subr.bf16.mxu0 %v1510_v33  ;;  %v751_v33 = vld [vmem:[%s2266_s7 + $0x40] sm:$0xff] }
  0x6b   : > { %1529 = vmatpush3.bf16.msra.mxu1 %v1526_v26  ;;  %v1538_v35 = vpack.c.bf16 %v752_v34, %v751_v33 }
  0x6c   : > { %1531 = vmatprep.subr.bf16.mxu1 %v1530_v29 }
  0x6d   : > { %1513 = vmatpush3.bf16.msra.mxu0 %v1512_v38  ;;  %v1542_v38 = vpack.c.bf16 %v754_v37, %v753_v36  ;;  %v1378_v37 = vld [vmem:[%s2267_s8] ss:$0 sm:$0xff] }
  0x6e   : > { %1515 = vmatprep.subr.bf16.mxu0 %v1514_v39  ;;  %v755_v39 = vld [vmem:[%s2266_s7 + $0x60] sm:$0xff] }
  0x6f   : > { %1533 = vmatpush3.bf16.msra.mxu1 %v1530_v29  ;;  %v1546_v41 = vpack.c.bf16 %v756_v40, %v755_v39  ;;  %v892_v40 = vld [vmem:[%s2268_s9 + $0x8] sm:$0xff] }
  0x70   : > { %1535 = vmatprep.subr.bf16.mxu1 %v1534_v32 }
  0x71   : > { %1517 = vmatpush3.bf16.msra.mxu0 %v1516_v44  ;;  %v1550_v44 = vpack.c.bf16 %v758_v43, %v757_v42 }
  0x72   : > { %1519 = vmatprep.subr.bf16.mxu0 %v1518_v45 }
  0x73   : > { %1537 = vmatpush3.bf16.msra.mxu1 %v1534_v32 }
  0x74   : > { %1539 = vmatprep.subr.bf16.mxu1 %v1538_v35 }
  0x75   : > { %1521 = vmatpush3.bf16.msra.mxu0 %v1520_v48 }
  0x77   : > { %1541 = vmatpush3.bf16.msra.mxu1 %v1538_v35 }
  0x78   : > { %633 = vmatmul.mubr.f32.vlgmr.msra.gmra.mrb[0].mxu0 %v521_v49  ;;  %1543 = vmatprep.subr.bf16.mxu1 %v1542_v38 }
  0x79   : > { %637 = vmatprep.mubr.f32.mxu0 %v524_v50 }
  0x7b   : > { %1545 = vmatpush3.bf16.msra.mxu1 %v1542_v38 }
  0x7c   : > { %638 = vmatmul.mubr.f32.gmra.mrb[2].mxu0 %v523_v51  ;;  %1547 = vmatprep.subr.bf16.mxu1 %v1546_v41 }
  0x7d   : > { %642 = vmatprep.mubr.f32.mxu0 %v526_v52 }
  0x7f   : > { %1549 = vmatpush3.bf16.msra.mxu1 %v1546_v41  ;;  %v894_v41 = vld [vmem:[%s2268_s9 + $0x18] sm:$0xff] }
  0x80   : > { %643 = vmatmul.mubr.f32.gmra.mrb[4].mxu0 %v525_v53  ;;  %1551 = vmatprep.subr.bf16.mxu1 %v1550_v44  ;;  %v1554_v43 = vpack.c.bf16 %v894_v41, %v892_v40  ;;  %v897_v41 = vlaneseq }
  0x81   : > { %647 = vmatprep.mubr.f32.mxu0 %v528_v54 }
  0x82   : > { %1555 = vmatprep.subr.bf16.mxu0 %v1554_v43 }
  0x83   : > { %1553 = vmatpush3.bf16.msra.mxu1 %v1550_v44  ;;  %v891_v44 = vld [vmem:[%s2268_s9] sm:$0xff] }
  0x84   : > { %648 = vmatmul.mubr.f32.gmra.mrb[6].mxu0 %v527_v55  ;;  %1558 = vmatprep.subr.bf16.mxu1 %v1554_v43 }
 0x14b   : > { %v1420_v59 = vpop.f32.mrb[0].mxu0 }
 0x14c   : > { %v1421_v61 = vpop.f32.mrb[1].mxu0 }
 0x14d   : > { %v1422_v62 = vadd.f32 %v1421_v61, %v1420_v59 }
 0x14f   : > { %v635_v63 = vadd.f32 %v1422_v62, %v1375_v60  ;;  %v1423_v0 = vpop.f32.mrb[2].mxu0 }
 0x150   : > { %v1424_v1 = vpop.f32.mrb[3].mxu0 }
 0x151   : > { %v1425_v2 = vadd.f32 %v1424_v1, %v1423_v0  ;;  %vm653_vm0 = vcmp.ge.f32.partialorder %v635_v63, 0.0  ;;  %v657_v3 = vmul.f32 0.01, %v635_v63 }
 0x153   : > { %v640_v4 = vadd.f32 %v1425_v2, %v1375_v60  ;;  %v1426_v5 = vpop.f32.mrb[4].mxu0  ;;  %v1983_v6 = vsel %vm653_vm0, %v635_v63, %v657_v3 }
 0x154   : > { %v1427_v7 = vpop.f32.mrb[5].mxu0  ;;  %665 = vadd.xlane.f32.xlu0 %v1983_v6  ;;  %v677_v8 = vmul.f32 %v1983_v6, %v1983_v6 }
 0x155   : > { %v1428_v9 = vadd.f32 %v1427_v7, %v1426_v5  ;;  %vm654_vm1 = vcmp.ge.f32.partialorder %v640_v4, 0.0  ;;  %v658_v10 = vmul.f32 0.01, %v640_v4 }
 0x156   : > { %681 = vadd.xlane.f32.xlu1 %v677_v8 }
 0x157   : > { %v645_v11 = vadd.f32 %v1428_v9, %v1375_v60  ;;  %v1429_v12 = vpop.f32.mrb[6].mxu0  ;;  %v1988_v13 = vsel %vm654_vm1, %v640_v4, %v658_v10 }
 0x158   : > { %v1430_v14 = vpop.f32.mrb[7].mxu0  ;;  %667 = vadd.xlane.f32.xlu0 %v1988_v13  ;;  %v678_v15 = vmul.f32 %v1988_v13, %v1988_v13 }
 0x159   : > { %v1431_v16 = vadd.f32 %v1430_v14, %v1429_v12  ;;  %vm655_vm2 = vcmp.ge.f32.partialorder %v645_v11, 0.0  ;;  %v659_v17 = vmul.f32 0.01, %v645_v11 }
 0x15a   : > { %683 = vadd.xlane.f32.xlu1 %v678_v15 }
 0x15b   : > { %v650_v18 = vadd.f32 %v1431_v16, %v1375_v60  ;;  %v1993_v19 = vsel %vm655_vm2, %v645_v11, %v659_v17  ;;  %v1376_v16 = vld [vmem:[%s2264_s5] ss:$0 sm:$0xff] }
 0x15c   : > { %669 = vadd.xlane.f32.xlu0 %v1993_v19  ;;  %v679_v21 = vmul.f32 %v1993_v19, %v1993_v19 }
 0x15d   : > { %vm656_vm3 = vcmp.ge.f32.partialorder %v650_v18, 0.0  ;;  %v660_v20 = vmul.f32 0.01, %v650_v18 }
 0x15f   : > { %v1998_v22 = vsel %vm656_vm3, %v650_v18, %v660_v20  ;;  %v1377_v20 = vld [vmem:[%s2265_s6] ss:$0 sm:$0xff] }
 0x160   : > { %685 = vadd.xlane.f32.xlu0 %v679_v21  ;;  %671 = vadd.xlane.f32.xlu1 %v1998_v22  ;;  %v680_v23 = vmul.f32 %v1998_v22, %v1998_v22 }
 0x164   : > { %687 = vadd.xlane.f32.xlu1 %v680_v23 }
 0x1e1   : > { %v666_v45 = vpop.xlane.xlu0 %665 }
 0x1e2   : > { %v673_v46 = vmul.f32 0.025, %v666_v45  ;;  %v893_v45 = vld [vmem:[%s2268_s9 + $0x10] sm:$0xff] }
 0x1e3   : > { %v682_v47 = vpop.xlane.xlu1 %681 }
 0x1e4   : > { %v693_v48 = vmul.f32 %v673_v46, %v673_v46  ;;  %v689_v49 = vmul.f32 0.025, %v682_v47  ;;  %v705_v12 = vsub.f32 %v1983_v6, %v673_v46  ;;  %v1556_v47 = vpack.c.bf16 %v893_v45, %v891_v44  ;;  %v895_v44 = vld [vmem:[%s2269_s10] sm:$0x3] }
 0x1e5   : > { %v668_v50 = vpop.xlane.xlu0 %667 }
 0x1e6   : > { %v697_v51 = vsub.f32 %v689_v49, %v693_v48  ;;  %v674_v52 = vmul.f32 0.025, %v668_v50  ;;  %1557 = vmatpush1.bf16.msra.mxu0 %v1556_v47  ;;  %v1769_v50 = vmov 0.0  }
 0x1e7   : > { %v684_v53 = vpop.xlane.xlu1 %683  ;;  %984 = vmatprep.mubr.f32.mxu0 %v1769_v50 }
 0x1e8   : > { %v701_v54 = vmax.f32 %v697_v51, 0.0  ;;  %v694_v55 = vmul.f32 %v674_v52, %v674_v52  ;;  %v690_v56 = vmul.f32 0.025, %v684_v53  ;;  %v706_v21 = vsub.f32 %v1988_v13, %v674_v52 }
 0x1e9   : > { %v670_v57 = vpop.xlane.xlu0 %669 }
 0x1ea   : > { %v709_v58 = vadd.f32 0.1, %v701_v54  ;;  %v698_v59 = vsub.f32 %v690_v56, %v694_v55  ;;  %v675_v60 = vmul.f32 0.025, %v670_v57  ;;  %v851_v57 = vld [vmem:[%s499_s26] sm:$0xff] }
 0x1ec   : > { %1617 = vrsqrt.f32 %v709_v58  ;;  %v702_v61 = vmax.f32 %v698_v59, 0.0  ;;  %v695_v1 = vmul.f32 %v675_v60, %v675_v60  ;;  %v707_v27 = vsub.f32 %v1993_v19, %v675_v60 }
 0x1ed   : > { %v686_v62 = vpop.xlane.xlu0 %685  ;;  %v672_v63 = vpop.xlane.xlu1 %671 }
 0x1ee   : > { %v710_v0 = vadd.f32 0.1, %v702_v61  ;;  %v691_v2 = vmul.f32 0.025, %v686_v62  ;;  %v676_v3 = vmul.f32 0.025, %v672_v63  ;;  %v1109_v62 = vmul.f32 %v851_v57, %v851_v57 }
 0x1ef   : > { %v853_v63 = vld [vmem:[%s499_s26 + $0x10] sm:$0xff] }
 0x1f0   : > { %1619 = vrsqrt.f32 %v710_v0  ;;  %v699_v4 = vsub.f32 %v691_v2, %v695_v1  ;;  %v696_v8 = vmul.f32 %v676_v3, %v676_v3  ;;  %v708_v31 = vsub.f32 %v1998_v22, %v676_v3  ;;  %v854_v1 = vld [vmem:[%s499_s26 + $0x18] sm:$0xff] }
 0x1f1   : > { %v688_v5 = vpop.xlane.xlu1 %687  ;;  %v1111_v0 = vmul.f32 %v853_v63, %v853_v63  ;;  %v1112_v2 = vmul.f32 %v854_v1, %v854_v1 }
 0x1f2   : > { %v703_v7 = vmax.f32 %v699_v4, 0.0  ;;  %v692_v9 = vmul.f32 0.025, %v688_v5  ;;  %v852_v4 = vld [vmem:[%s499_s26 + $0x8] sm:$0xff]  ;;  %s505_s26 = scalar_lea.vmem %s2294_s0, %s2081_s18 }
 0x1f4   : > { %v711_v10 = vadd.f32 0.1, %v703_v7  ;;  %v700_v11 = vsub.f32 %v692_v9, %v696_v8  ;;  %v1110_v7 = vmul.f32 %v852_v4, %v852_v4 }
 0x1f6   : > { %v1618_v14 = vpop.eup %1617  ;;  %1621 = vrsqrt.f32 %v711_v10  ;;  %v704_v15 = vmax.f32 %v700_v11, 0.0 }
 0x1f7   : > { %v717_v17 = vmul.f32 %v1618_v14, %v705_v12 }
 0x1f8   : > { %v712_v18 = vadd.f32 0.1, %v704_v15 }
 0x1f9   : > { %v728_v23 = vmul.f32 %v1376_v16, %v717_v17 }
 0x1fa   : > { %v1620_v24 = vpop.eup %1619  ;;  %1623 = vrsqrt.f32 %v712_v18 }
 0x1fb   : > { %v739_v25 = vadd.f32 %v1377_v20, %v728_v23  ;;  %v718_v6 = vmul.f32 %v1620_v24, %v706_v21 }
 0x1fd   : > { %1484 = vmatprep.mubr.f32.mxu1 %v739_v25  ;;  %v729_v26 = vmul.f32 %v1376_v16, %v718_v6 }
 0x1ff   : > { %v740_v28 = vadd.f32 %v1377_v20, %v729_v26 }
 0x200   : > { %v1622_v29 = vpop.eup %1621 }
 0x201   : > { %1485 = vmatmul.mubr.f32.vlgmr.msra.gmra.mrb[0].mxu1 %v740_v28  ;;  %v719_v30 = vmul.f32 %v1622_v29, %v707_v27 }
 0x202   : > { %1559 = vmatpush1.bf16.msra.mxu1 %v1556_v47 }
 0x203   : > { %v730_v32 = vmul.f32 %v1376_v16, %v719_v30 }
 0x204   : > { %v1624_v33 = vpop.eup %1623 }
 0x205   : > { %v741_v34 = vadd.f32 %v1377_v20, %v730_v32  ;;  %v720_v13 = vmul.f32 %v1624_v33, %v708_v31 }
 0x207   : > { %1487 = vmatprep.mubr.f32.mxu1 %v741_v34  ;;  %v731_v35 = vmul.f32 %v1376_v16, %v720_v13 }
 0x209   : > { %v742_v36 = vadd.f32 %v1377_v20, %v731_v35 }
 0x20b   : > { %1488 = vmatmul.mubr.f32.gmra.mrb[2].mxu1 %v742_v36 }
 0x20c   : > { %990 = vmatprep.mubr.f32.mxu1 %v1769_v50 }
 0x2d4   : > { %v1486_v19 = vpop.f32.mrb[0].mxu1 }
 0x2d5   : > { %v2060_v38 = vadd.f32 %v1486_v19, %v1378_v37  ;;  %v832_v39 = vpop.f32.mrb[1].mxu1 }
 0x2d6   : > { %v2062_v22 = vadd.f32 %v1378_v37, %v832_v39 }
 0x2d7   : > { %v856_v42 = vmul.f32 0.5, %v2060_v38 }
 0x2d8   : > { %v855_v46 = vmul.f32 0.5, %v2062_v22 }
 0x2d9   : > { %v861_v48 = vmul.f32 1.442695, %v856_v42  ;;  %v898_v42 = vshrl.u32 %v897_v41, 7 }
 0x2da   : > { %v859_v49 = vmul.f32 1.442695, %v855_v46 }
 0x2db   : > { %1625 = vpow2.f32 %v861_v48  ;;  %v899_v43 = vsub.s32 0, %v898_v42  ;;  %v903_v45 = vsub.s32 1, %v898_v42 }
 0x2dc   : > { %1627 = vpow2.f32 %v859_v49 }
 0x2dd   : > { %v900_v46 = vrot.slane %v895_v44, %v899_v43  ;;  %v904_v47 = vrot.slane %v895_v44, %v903_v45 }
 0x2de   : > { %v1489_v51 = vpop.f32.mrb[2].mxu1 }
 0x2df   : > { %v2083_v52 = vadd.f32 %v1489_v51, %v1378_v37  ;;  %v842_v53 = vpop.f32.mrb[3].mxu1 }
 0x2e0   : > { %v2085_v54 = vadd.f32 %v1378_v37, %v842_v53 }
 0x2e1   : > { %v858_v55 = vmul.f32 0.5, %v2083_v52 }
 0x2e2   : > { %v857_v56 = vmul.f32 0.5, %v2085_v54 }
 0x2e3   : > { %v865_v61 = vmul.f32 1.442695, %v858_v55 }
 0x2e4   : > { %v863_v58 = vmul.f32 1.442695, %v857_v56 }
 0x2e5   : > { %v1626_v59 = vpop.eup %1625 }
 0x2e6   : > { %v1628_v60 = vpop.eup %1627  ;;  %1629 = vpow2.f32 %v863_v58  ;;  %873 = vrot.lane.b32.xlu0 %v1626_v59, %s1770_s27 }
 0x2e7   : > { %871 = vrot.lane.b32.xlu1 %v1628_v60, %s1770_s27  ;;  %1631 = vpow2.f32 %v865_v61 }
 0x2ea   : > { %1117 = vrot.lane.b32.xlu0 %v1109_v62, %s1771_s28 }
 0x2ee   : > { %1121 = vrot.lane.b32.xlu0 %v1111_v0, %s1771_s28 }
 0x2f0   : > { %v1630_v3 = vpop.eup %1629 }
 0x2f1   : > { %875 = vrot.lane.b32.xlu1 %v1630_v3, %s1770_s27  ;;  %v1632_v5 = vpop.eup %1631 }
 0x2f2   : > { %1123 = vrot.lane.b32.xlu0 %v1112_v2, %s1771_s28 }
 0x2f5   : > { %877 = vrot.lane.b32.xlu1 %v1632_v5, %s1770_s27 }
 0x2f9   : > { %1119 = vrot.lane.b32.xlu1 %v1110_v7, %s1771_s28 }
 0x358   : > { %v874_v8 = vpop.permute.xlu0 %873 }
 0x359   : > { %v884_v9 = vmul.f32 %v874_v8, %v852_v4  ;;  %v872_v10 = vpop.permute.xlu1 %871 }
 0x35a   : > { %v883_v11 = vmul.f32 %v872_v10, %v851_v57 }
 0x35b   : > { %v2102_v12 = vadd.f32 %v884_v9, %v2060_v38 }
 0x35c   : > { %v2105_v14 = vadd.f32 %v883_v11, %v2062_v22  ;;  %v1118_v26 = vpop.permute.xlu0 %1117 }
 0x35d   : > { %1380 = vmatmul.mubr.msk.f32.vlgmr.msra.gmra.mrb[4].mxu1 %vm907_vm4, %v2102_v12  ;;  %v1134_v15 = vmul.f32 %v2102_v12, %v2102_v12  ;;  %v1129_v32 = vadd.f32 %v1118_v26, %v2062_v22 }
 0x35e   : > { %1379 = vmatmul.mubr.msk.f32.vlgmr.msra.gmra.mrb[8].mxu0 %vm907_vm4, %v2105_v14  ;;  %996 = vmatprep.mubr.f32.mxu1 %v1769_v50  ;;  %v1133_v16 = vmul.f32 %v2105_v14, %v2105_v14 }
 0x35f   : > { %1143 = vrot.lane.b32.xlu1 %v1134_v15, %s1771_s28 }
 0x360   : > { %v1122_v30 = vpop.permute.xlu0 %1121 }
 0x361   : > { %v1131_v35 = vadd.f32 %v1122_v30, %v2085_v54 }
 0x363   : > { %1141 = vrot.lane.b32.xlu1 %v1133_v16, %s1771_s28  ;;  %v876_v17 = vpop.permute.xlu1 %875 }
 0x364   : > { %v885_v18 = vmul.f32 %v876_v17, %v853_v63  ;;  %v1124_v13 = vpop.permute.xlu0 %1123 }
 0x365   : > { %v1132_v19 = vadd.f32 %v1124_v13, %v2083_v52 }
 0x366   : > { %v2118_v20 = vadd.f32 %v885_v18, %v2085_v54 }
 0x367   : > { %v878_v21 = vpop.permute.xlu1 %877 }
 0x368   : > { %v886_v23 = vmul.f32 %v878_v21, %v854_v1  ;;  %1381 = vmatmul.mubr.msk.f32.gmra.mrb[6].mxu1 %vm907_vm4, %v2118_v20  ;;  %v1135_v24 = vmul.f32 %v2118_v20, %v2118_v20 }
 0x369   : > { %1002 = vmatprep.mubr.f32.mxu1 %v1769_v50 }
 0x36a   : > { %v2125_v25 = vadd.f32 %v886_v23, %v2083_v52  ;;  %1145 = vrot.lane.b32.xlu0 %v1135_v24, %s1771_s28 }
 0x36b   : > { %v1120_v27 = vpop.permute.xlu1 %1119 }
 0x36c   : > { %1382 = vmatmul.mubr.msk.f32.gmra.mrb[8].mxu1 %vm907_vm4, %v2125_v25  ;;  %v1136_v6 = vmul.f32 %v2125_v25, %v2125_v25  ;;  %v1130_v28 = vadd.f32 %v1120_v27, %v2060_v38 }
 0x36e   : > { %1147 = vrot.lane.b32.xlu1 %v1136_v6, %s1771_s28 }
 0x3d1   : > { %v1144_v29 = vpop.permute.xlu1 %1143 }
 0x3d2   : > { %v1154_v31 = vsub.f32 %v1130_v28, %v1144_v29 }
 0x3d4   : > { %1163 = vrot.lane.b32.xlu1 %v1154_v31, %s1770_s27 }
 0x3d5   : > { %v1142_v33 = vpop.permute.xlu1 %1141 }
 0x3d6   : > { %v1153_v34 = vsub.f32 %v1129_v32, %v1142_v33 }
 0x3d8   : > { %1161 = vrot.lane.b32.xlu0 %v1153_v34, %s1770_s27 }
 0x3dc   : > { %v1146_v36 = vpop.permute.xlu0 %1145 }
 0x3dd   : > { %v1155_v37 = vsub.f32 %v1131_v35, %v1146_v36 }
 0x3df   : > { %1165 = vrot.lane.b32.xlu0 %v1155_v37, %s1770_s27 }
 0x3e0   : > { %v1148_v39 = vpop.permute.xlu1 %1147 }
 0x3e1   : > { %v1156_v40 = vsub.f32 %v1132_v19, %v1148_v39 }
 0x3e3   : > { %1167 = vrot.lane.b32.xlu1 %v1156_v40, %s1770_s27 }
 0x430   : > { %v992_v48 = vpop.f32.mrb[4].mxu1 }
 0x431   : > { %v2144_v49 = vadd.f32 %v992_v48, %v900_v46  ;;  %v986_v50 = vpop.f32.mrb[8].mxu0  ;;  %v994_v51 = vpop.f32.mrb[5].mxu1 }
 0x432   : > { %v2146_v53 = vadd.f32 %v986_v50, %v900_v46  ;;  %v2148_v55 = vadd.f32 %v994_v51, %v904_v47  ;;  %v988_v56 = vpop.f32.mrb[9].mxu0 }
 0x433   : > { %v1011_v57 = vsub.f32 0.0, %v2144_v49  ;;  %v2151_v58 = vadd.f32 %v988_v56, %v904_v47 }
 0x434   : > { %v1009_v59 = vsub.f32 0.0, %v2146_v53  ;;  %v1012_v60 = vsub.f32 0.0, %v2148_v55  ;;  %v514_v55 = vld [vmem:[%s2190_s17 + $0x8] sm:$0xff] }
 0x435   : > { %v1027_v61 = vand.u32 2147483647, %v1011_v57  ;;  %v1010_v62 = vsub.f32 0.0, %v2151_v58 }
 0x436   : > { %v1025_v63 = vand.u32 2147483647, %v1009_v59  ;;  %v1028_v0 = vand.u32 2147483647, %v1012_v60 }
 0x437   : > { %v1035_v1 = vsub.f32 0.0, %v1027_v61  ;;  %v1026_v2 = vand.u32 2147483647, %v1010_v62 }
 0x438   : > { %v1033_v3 = vsub.f32 0.0, %v1025_v63  ;;  %v1036_v4 = vsub.f32 0.0, %v1028_v0 }
 0x439   : > { %v1045_v5 = vmul.f32 1.442695, %v1035_v1  ;;  %v1034_v7 = vsub.f32 0.0, %v1026_v2 }
 0x43a   : > { %v1041_v8 = vmul.f32 1.442695, %v1033_v3  ;;  %v1047_v9 = vmul.f32 1.442695, %v1036_v4 }
 0x43b   : > { %1633 = vpow2.f32 %v1045_v5  ;;  %v1043_v10 = vmul.f32 1.442695, %v1034_v7  ;;  %v998_v11 = vpop.f32.mrb[6].mxu1  ;;  %v1019_v7 = vmax.f32 %v1011_v57, 0.0  ;;  %v513_v57 = vld [vmem:[%s2190_s17] sm:$0xff] }
 0x43c   : > { %1635 = vpow2.f32 %v1041_v8  ;;  %v2164_v15 = vadd.f32 %v998_v11, %v900_v46  ;;  %v1000_v16 = vpop.f32.mrb[7].mxu1 }
 0x43d   : > { %1637 = vpow2.f32 %v1047_v9  ;;  %v2166_v17 = vadd.f32 %v1000_v16, %v904_v47  ;;  %v515_v16 = vld [vmem:[%s2190_s17 + $0x10] sm:$0xff] }
 0x43e   : > { %1639 = vpow2.f32 %v1043_v10  ;;  %v1013_v18 = vsub.f32 0.0, %v2164_v15  ;;  %v1017_v10 = vmax.f32 %v1009_v59, 0.0 }
 0x43f   : > { %v1014_v21 = vsub.f32 0.0, %v2166_v17  ;;  %v1004_v23 = vpop.f32.mrb[8].mxu1 }
 0x440   : > { %v1029_v24 = vand.u32 2147483647, %v1013_v18  ;;  %v2172_v6 = vadd.f32 %v1004_v23, %v900_v46  ;;  %v1006_v26 = vpop.f32.mrb[9].mxu1 }
 0x441   : > { %v1030_v27 = vand.u32 2147483647, %v1014_v21  ;;  %v2176_v28 = vadd.f32 %v1006_v26, %v904_v47  ;;  %v1020_v26 = vmax.f32 %v1012_v60, 0.0 }
 0x442   : > { %v1037_v29 = vsub.f32 0.0, %v1029_v24  ;;  %v1015_v30 = vsub.f32 0.0, %v2172_v6 }
 0x443   : > { %v1038_v31 = vsub.f32 0.0, %v1030_v27  ;;  %v1016_v32 = vsub.f32 0.0, %v2176_v28 }
 0x444   : > { %v1049_v33 = vmul.f32 1.442695, %v1037_v29  ;;  %v1031_v34 = vand.u32 2147483647, %v1015_v30  ;;  %v1023_v15 = vmax.f32 %v1015_v30, 0.0 }
 0x445   : > { %v1634_v13 = vpop.eup %1633  ;;  %v1051_v35 = vmul.f32 1.442695, %v1038_v31  ;;  %v1032_v36 = vand.u32 2147483647, %v1016_v32  ;;  %v1024_v17 = vmax.f32 %v1016_v32, 0.0 }
 0x446   : > { %v1636_v37 = vpop.eup %1635  ;;  %v1059_v19 = vadd.f32 1.0, %v1634_v13  ;;  %1641 = vpow2.f32 %v1049_v33  ;;  %v1039_v39 = vsub.f32 0.0, %v1031_v34  ;;  %v1164_v40 = vpop.permute.xlu1 %1163  ;;  %v1018_v33 = vmax.f32 %v1010_v62, 0.0  ;;  %v516_v34 = vld [vmem:[%s2190_s17 + $0x18] sm:$0xff] }
 0x447   : > { %v1638_v41 = vpop.eup %1637  ;;  %v1057_v42 = vadd.f32 1.0, %v1636_v37  ;;  %1643 = vpow2.f32 %v1051_v35  ;;  %v1040_v43 = vsub.f32 0.0, %v1032_v36  ;;  %v1176_v44 = vsel %vm907_vm4, %v1164_v40, 0.0 }
 0x448   : > { %v1640_v45 = vpop.eup %1639  ;;  %1645 = vlog2.f32 %v1059_v19  ;;  %v1060_v46 = vadd.f32 1.0, %v1638_v41  ;;  %v1053_v47 = vmul.f32 1.442695, %v1039_v39  ;;  %1177 = vadd.xlane.f32.xlu1 %v1176_v44  ;;  %v1021_v44 = vmax.f32 %v1013_v18, 0.0 }
 0x449   : > { %1647 = vlog2.f32 %v1057_v42  ;;  %v1058_v48 = vadd.f32 1.0, %v1640_v45  ;;  %v1055_v50 = vmul.f32 1.442695, %v1040_v43 }
 0x44a   : > { %1649 = vlog2.f32 %v1060_v46  ;;  %v1162_v51 = vpop.permute.xlu0 %1161  ;;  %v1022_v46 = vmax.f32 %v1014_v21, 0.0 }
 0x44b   : > { %1651 = vlog2.f32 %v1058_v48  ;;  %v1173_v56 = vsel %vm907_vm4, %v1162_v51, 0.0  ;;  %v517_v48 = vld [vmem:[%s2190_s17 + $0x20] sm:$0xff]  ;;  %v518_v51 = vld [vmem:[%s2190_s17 + $0x28] sm:$0xff] }
 0x44c   : > { %1653 = vpow2.f32 %v1053_v47  ;;  %1174 = vadd.xlane.f32.xlu0 %v1173_v56 }
 0x44d   : > { %1655 = vpow2.f32 %v1055_v50 }
 0x450   : > { %v1642_v61 = vpop.eup %1641 }
 0x451   : > { %v1644_v63 = vpop.eup %1643  ;;  %v1061_v0 = vadd.f32 1.0, %v1642_v61  ;;  %v1166_v1 = vpop.permute.xlu0 %1165 }
 0x452   : > { %v1646_v2 = vpop.eup %1645  ;;  %v1062_v3 = vadd.f32 1.0, %v1644_v63  ;;  %v1179_v4 = vsel %vm907_vm4, %v1166_v1, 0.0 }
 0x453   : > { %v1648_v5 = vpop.eup %1647  ;;  %v1070_v8 = vmul.f32 0.6931472, %v1646_v2  ;;  %1657 = vlog2.f32 %v1061_v0  ;;  %1180 = vadd.xlane.f32.xlu0 %v1179_v4 }
 0x454   : > { %v1650_v9 = vpop.eup %1649  ;;  %v1066_v11 = vmul.f32 0.6931472, %v1648_v5  ;;  %1659 = vlog2.f32 %v1062_v3  ;;  %v519_v3 = vld [vmem:[%s2190_s17 + $0x30] sm:$0xff]  ;;  %v520_v5 = vld [vmem:[%s2190_s17 + $0x38] sm:$0xff] }
 0x455   : > { %v1652_v23 = vpop.eup %1651  ;;  %v1083_v24 = vadd.f32 %v1070_v8, %v1019_v7  ;;  %v1072_v27 = vmul.f32 0.6931472, %v1650_v9  ;;  %v1168_v49 = vpop.permute.xlu1 %1167 }
 0x456   : > { %v1654_v29 = vpop.eup %1653  ;;  %v1081_v31 = vadd.f32 %v1066_v11, %v1017_v10  ;;  %v1068_v53 = vmul.f32 0.6931472, %v1652_v23  ;;  %v1182_v59 = vsel %vm907_vm4, %v1168_v49, 0.0 }
 0x457   : > { %v1656_v13 = vpop.eup %1655  ;;  %v1084_v35 = vadd.f32 %v1072_v27, %v1020_v26  ;;  %v1063_v36 = vadd.f32 1.0, %v1654_v29  ;;  %1183 = vadd.xlane.f32.xlu1 %v1182_v59  ;;  %v1091_v37 = vmul.f32 %v1083_v24, %v515_v16 }
 0x458   : > { %v1082_v19 = vadd.f32 %v1068_v53, %v1018_v33  ;;  %v1064_v60 = vadd.f32 1.0, %v1656_v13  ;;  %v1089_v39 = vmul.f32 %v1081_v31, %v513_v57 }
 0x459   : > { %1661 = vlog2.f32 %v1063_v36  ;;  %v1092_v40 = vmul.f32 %v1084_v35, %v516_v34 }
 0x45a   : > { %1663 = vlog2.f32 %v1064_v60  ;;  %v1090_v58 = vmul.f32 %v1082_v19, %v514_v55 }
 0x45b   : > { %v1100_v62 = vadd.f32 %v1092_v40, %v1091_v37 }
 0x45c   : > { %v1097_v41 = vadd.f32 %v1090_v58, %v1089_v39 }
 0x45d   : > { %v1658_v42 = vpop.eup %1657  ;;  %1101 = vadd.xlane.f32.xlu0 %v1100_v62 }
 0x45e   : > { %v1660_v43 = vpop.eup %1659  ;;  %v1074_v45 = vmul.f32 0.6931472, %v1658_v42 }
 0x45f   : > { %v1076_v47 = vmul.f32 0.6931472, %v1660_v43 }
 0x460   : > { %v1085_v50 = vadd.f32 %v1074_v45, %v1021_v44 }
 0x461   : > { %v1086_v56 = vadd.f32 %v1076_v47, %v1022_v46  ;;  %1098 = vadd.xlane.f32.xlu0 %v1097_v41 }
 0x462   : > { %v1093_v61 = vmul.f32 %v1085_v50, %v517_v48 }
 0x463   : > { %v1662_v63 = vpop.eup %1661  ;;  %v1094_v0 = vmul.f32 %v1086_v56, %v518_v51 }
 0x464   : > { %v1664_v1 = vpop.eup %1663  ;;  %v1078_v18 = vmul.f32 0.6931472, %v1662_v63 }
 0x465   : > { %v1080_v21 = vmul.f32 0.6931472, %v1664_v1  ;;  %v1103_v2 = vadd.f32 %v1094_v0, %v1093_v61 }
 0x466   : > { %v1087_v4 = vadd.f32 %v1078_v18, %v1023_v15 }
 0x467   : > { %v1088_v7 = vadd.f32 %v1080_v21, %v1024_v17  ;;  %1104 = vadd.xlane.f32.xlu0 %v1103_v2 }
 0x468   : > { %1191 = vrot.lane.b32.xlu1 %v2102_v12, %s1771_s28  ;;  %v1095_v8 = vmul.f32 %v1087_v4, %v519_v3 }
 0x469   : > { %v1096_v9 = vmul.f32 %v1088_v7, %v520_v5 }
 0x46b   : > { %v1106_v10 = vadd.f32 %v1096_v9, %v1095_v8 }
 0x46c   : > { %1193 = vrot.lane.b32.xlu1 %v2118_v20, %s1771_s28 }
 0x47d   : > { %1189 = vrot.lane.b32.xlu0 %v2105_v14, %s1771_s28 }
 0x490   : > { %1107 = vadd.xlane.f32.xlu1 %v1106_v10 }
 0x4a1   : > { %1195 = vrot.lane.b32.xlu1 %v2125_v25, %s1771_s28 }
 0x4d5   : > { %v1178_v30 = vpop.xlane.xlu1 %1177 }
 0x4d6   : > { %v1186_v16 = vmul.f32 -0.5, %v1178_v30 }
 0x4d9   : > { %v1175_v6 = vpop.xlane.xlu0 %1174 }
 0x4da   : > { %v1185_v12 = vmul.f32 -0.5, %v1175_v6 }
 0x4e0   : > { %v1181_v28 = vpop.xlane.xlu0 %1180 }
 0x4e1   : > { %v1187_v25 = vmul.f32 -0.5, %v1181_v28 }
 0x4e4   : > { %v1184_v11 = vpop.xlane.xlu1 %1183 }
 0x4e5   : > { %v1188_v53 = vmul.f32 -0.5, %v1184_v11 }
 0x4e8   : > { %v1192_v24 = vpop.permute.xlu1 %1191 }
 0x4e9   : > { %v1202_v31 = vsel %vm907_vm4, %v2060_v38, %v1192_v24 }
 0x4ea   : > { %v1102_v32 = vpop.xlane.xlu0 %1101  ;;  %1207 = vst.msk [vmem:[%s505_s26 + $0x8] sm:$0xff] %vm1205_vm6, %v1202_v31 }
 0x4eb   : > { %v1211_v14 = vadd.f32 %v1186_v16, %v1102_v32 }
 0x4ec   : > { %v1194_v49 = vpop.permute.xlu1 %1193 }
 0x4ed   : > { %1216 = vst.msk [vmem:[%s511_s14 + $0x8] sm:$0xff] %vm1214_vm5, %v1211_v14  ;;  %v1203_v33 = vsel %vm907_vm4, %v2085_v54, %v1194_v49 }
 0x4ee   : > { %v1099_v20 = vpop.xlane.xlu0 %1098  ;;  %1208 = vst.msk [vmem:[%s505_s26 + $0x10] sm:$0xff] %vm1205_vm6, %v1203_v33 }
 0x4ef   : > { %v1210_v23 = vadd.f32 %v1185_v12, %v1099_v20 }
 0x4f1   : > { %1215 = vst.msk [vmem:[%s511_s14] sm:$0xff] %vm1214_vm5, %v1210_v23 }
 0x4f4   : > { %v1105_v26 = vpop.xlane.xlu0 %1104 }
 0x4f5   : > { %v1212_v27 = vadd.f32 %v1187_v25, %v1105_v26 }
 0x4f7   : > { %1217 = vst.msk [vmem:[%s511_s14 + $0x10] sm:$0xff] %vm1214_vm5, %v1212_v27 }
 0x4f8   : > { %v1190_v57 = vpop.permute.xlu0 %1189 }
 0x4f9   : > { %v1201_v29 = vsel %vm907_vm4, %v2062_v22, %v1190_v57 }
 0x4fa   : > { %1206 = vst.msk [vmem:[%s505_s26] sm:$0xff] %vm1205_vm6, %v1201_v29 }
 0x51d   : > { %v1108_v59 = vpop.xlane.xlu1 %1107 }
 0x51e   : > { %v1213_v34 = vadd.f32 %v1188_v53, %v1108_v59 }
 0x520   : > { %1218 = vst.msk [vmem:[%s511_s14 + $0x18] sm:$0xff] %vm1214_vm5, %v1213_v34 }
 0x521   : > { %v1196_v13 = vpop.permute.xlu1 %1195 }
 0x522   : > { %v1204_v35 = vsel %vm907_vm4, %v2083_v52, %v1196_v13 }
 0x523   : > { %1209 = vst.msk [vmem:[%s505_s26 + $0x18] sm:$0xff] %vm1205_vm6, %v1204_v35 }
 0x524 PF: > { %s2295_s24 = sld [smem:[#allocation8_spill]]  ;;  %s2296_s21 = smov %s1753_s22 }
 0x525   : > { %s2297_s22 = smov %s1757_s23  ;;  %s2298_s23 = smov %s1910_s11 }
 0x52a   : > { %p24_p6 = scmp.ge.s32.totalorder %s2295_s24, 4  }
 0x52c   :  { %26 = sbr.rel (!%p24_p6) target bundleno = 8 (0x8), region = 126 }
 0x533   :  { %1258 = vsyncpa [#allocation3], 1 }
 0x534   :  { %1260 = vsyncpa [#allocation3 + $0x1], 1 }
 0x535   :  { %1261 = vsyncpa [#allocation5], 1 }

</bundles_post_ra>
